<compile_context>
chip_gen: v6e
topology: v6e:2x2x1
jax: 0.10.0
libtpu: 0.0.40
codegen_flags: <defaults>
</compile_context>

<pallas_src>
import functools
import math

import jax
import jax.numpy as jnp
from jax.experimental import pallas as pl
from jax.experimental.pallas import tpu as pltpu


def _pick_tile(dim, target):
    """Largest tile <= target that divides dim (full dim or a >=128 divisor)."""
    if dim <= target:
        return dim
    t = target
    while t >= 128:
        if dim % t == 0:
            return t
        t //= 2
    return dim


# ----------------------------- linear (tiled matmul) -------------------------

def _linear_kernel(x_ref, w_ref, b_ref, o_ref, acc_ref):
    # x: (tm, tk), w: (tk, tn), b: (1, tn) f32, o: (tm, tn), acc: (tm, tn) f32
    k = pl.program_id(2)

    @pl.when(k == 0)
    def _init():
        acc_ref[...] = jnp.zeros_like(acc_ref)

    acc_ref[...] += jnp.dot(x_ref[...], w_ref[...],
                            preferred_element_type=jnp.float32)

    @pl.when(k == pl.num_programs(2) - 1)
    def _epilogue():
        # bias added once, on the f32 accumulator
        o_ref[...] = (acc_ref[...] + b_ref[...]).astype(o_ref.dtype)


def pallas_linear(x2d, w, b, *, tm=256, tn=256, tk=512):
    """x2d: (M, K) @ w: (K, N) + b: (1, N) -> (M, N) in x2d.dtype (f32 accum)."""
    M, K = x2d.shape
    K2, N = w.shape
    assert K == K2
    tm, tn, tk = _pick_tile(M, tm), _pick_tile(N, tn), _pick_tile(K, tk)
    grid = (M // tm, N // tn, K // tk)
    return pl.pallas_call(
        _linear_kernel,
        out_shape=jax.ShapeDtypeStruct((M, N), x2d.dtype),
        grid=grid,
        in_specs=[
            pl.BlockSpec((tm, tk), lambda i, j, k: (i, k)),
            pl.BlockSpec((tk, tn), lambda i, j, k: (k, j)),
            pl.BlockSpec((1, tn), lambda i, j, k: (0, j)),   # varies only with j
        ],
        out_specs=pl.BlockSpec((tm, tn), lambda i, j, k: (i, j)),
        scratch_shapes=[pltpu.VMEM((tm, tn), jnp.float32)],
        compiler_params=pltpu.CompilerParams(
            dimension_semantics=("parallel", "parallel", "arbitrary")),
    )(x2d, w, b)


# ----------------------------- flash attention --------------------------------

def _flash_attn_kernel(q_ref, k_ref, v_ref, o_ref, m_sc, l_sc, acc_sc, *, scale):
    # Refs are (H, blk, Dh) tiles for one batch element; kv axis is the last
    # grid axis.  Online softmax statistics live in f32 scratch.
    qi = pl.program_id(1)
    ki = pl.program_id(2)

    @pl.when(ki == 0)
    def _init():
        m_sc[...] = jnp.full_like(m_sc, -jnp.inf)
        l_sc[...] = jnp.zeros_like(l_sc)
        acc_sc[...] = jnp.zeros_like(acc_sc)

    # Causal block skipping: blocks strictly above the diagonal contribute 0.
    @pl.when(ki <= qi)
    def _compute():
        h, blk_q, d_head = q_ref.shape
        blk_k = k_ref.shape[1]

        # Fold 1/sqrt(Dh) into q (blk*Dh muls instead of blk*blk).
        q = q_ref[...] * scale
        # Contract last dims directly -- no K transpose.
        s = jnp.einsum("hqd,hkd->hqk", q, k_ref[...],
                       preferred_element_type=jnp.float32)  # (H, blk_q, blk_k) f32

        # Mask (all-true for strictly-below-diagonal blocks; only the diagonal
        # block actually needs it, cost is tiny vs. the matmuls).
        row = qi * blk_q + jax.lax.broadcasted_iota(jnp.int32, (blk_q, blk_k), 0)
        col = ki * blk_k + jax.lax.broadcasted_iota(jnp.int32, (blk_q, blk_k), 1)
        s = jnp.where((col <= row)[None, :, :], s, -jnp.inf)

        m_prev = m_sc[...]
        m_new = jnp.maximum(m_prev, jnp.max(s, axis=-1, keepdims=True))
        alpha = jnp.exp(m_prev - m_new)
        p = jnp.exp(s - m_new)                               # f32 softmax math
        l_sc[...] = alpha * l_sc[...] + jnp.sum(p, axis=-1, keepdims=True)
        acc_sc[...] = alpha * acc_sc[...] + jnp.einsum(
            "hqk,hkd->hqd", p.astype(v_ref.dtype), v_ref[...],
            preferred_element_type=jnp.float32)
        m_sc[...] = m_new

    # Diagonal block is the last contributing kv block for this q tile.
    @pl.when(ki == qi)
    def _finalize():
        inv_l = pl.reciprocal(l_sc[...], approx=True)        # EUP, ~free
        o_ref[...] = (acc_sc[...] * inv_l).astype(o_ref.dtype)


def pallas_flash_attention(q, k, v, *, block=256):
    """q, k, v: (B, H, T, Dh) -> (B, H, T, Dh)."""
    B, H, T, Dh = q.shape
    blk = _pick_tile(T, block)
    nblk = T // blk
    scale = 1.0 / math.sqrt(Dh)

    q_spec = pl.BlockSpec((None, H, blk, Dh), lambda b, qi, ki: (b, 0, qi, 0))
    kv_spec = pl.BlockSpec((None, H, blk, Dh), lambda b, qi, ki: (b, 0, ki, 0))

    return pl.pallas_call(
        functools.partial(_flash_attn_kernel, scale=scale),
        out_shape=jax.ShapeDtypeStruct((B, H, T, Dh), q.dtype),
        grid=(B, nblk, nblk),
        in_specs=[q_spec, kv_spec, kv_spec],
        out_specs=pl.BlockSpec((None, H, blk, Dh), lambda b, qi, ki: (b, 0, qi, 0)),
        scratch_shapes=[
            pltpu.VMEM((H, blk, 1), jnp.float32),    # running max m
            pltpu.VMEM((H, blk, 1), jnp.float32),    # running sum l
            pltpu.VMEM((H, blk, Dh), jnp.float32),   # output accumulator
        ],
        compiler_params=pltpu.CompilerParams(
            dimension_semantics=("parallel", "parallel", "arbitrary")),
    )(q, k, v)


# ----------------------------- module forward ---------------------------------

def causal_self_attention(x, params, n_head, *, compute_dtype=None):
    """Forward pass matching the PyTorch module (inference, dropout=0).

    compute_dtype: dtype fed to the MXU (e.g. jnp.bfloat16); accumulation and
    softmax statistics stay f32 inside the kernels.
    """
    B, T, C = x.shape
    d_head = C // n_head
    dt = compute_dtype if compute_dtype is not None else x.dtype

    # QKV projection on the flattened (B*T, C) view.
    x2d = x.astype(dt).reshape(B * T, C)
    qkv = pallas_linear(x2d, params["w_qkv"].astype(dt), params["b_qkv"])
    qkv = qkv.reshape(B, T, 3 * C)
    q, k, v = jnp.split(qkv, 3, axis=2)

    def to_heads(t):  # (B, T, C) -> (B, H, T, Dh)
        return t.reshape(B, T, n_head, d_head).transpose(0, 2, 1, 3)

    q, k, v = to_heads(q), to_heads(k), to_heads(v)

    y = pallas_flash_attention(q, k, v)                 # (B, H, T, Dh)
    y = y.transpose(0, 2, 1, 3).reshape(B * T, C)

    out = pallas_linear(y, params["w_out"].astype(dt), params["b_out"])
    return out.reshape(B, T, C)


# ----------------------------- reference (pure JAX) ----------------------------

def reference(x, params, n_head):
    B, T, C = x.shape
    d_head = C // n_head
    qkv = x.reshape(B * T, C) @ params["w_qkv"] + params["b_qkv"][0]
    qkv = qkv.reshape(B, T, 3 * C)
    q, k, v = jnp.split(qkv, 3, axis=2)
    q, k, v = [t.reshape(B, T, n_head, d_head).transpose(0, 2, 1, 3) for t in (q, k, v)]
    att = jnp.einsum("bhqd,bhkd->bhqk", q, k) / math.sqrt(d_head)
    mask = jnp.tril(jnp.ones((T, T), bool))
    att = jnp.where(mask[None, None], att, -jnp.inf)
    att = jax.nn.softmax(att, axis=-1)
    y = jnp.einsum("bhqk,bhkd->bhqd", att, v)
    y = y.transpose(0, 2, 1, 3).reshape(B * T, C)
    return (y @ params["w_out"] + params["b_out"][0]).reshape(B, T, C)


# ----------------------------- main --------------------------------------------

if __name__ == "__main__":
    B, T, d_model, n_head = 2, 16, 128, 4

    key = jax.random.PRNGKey(0)
    kx, k1, k2, k3, k4 = jax.random.split(key, 5)

    x = jax.random.normal(kx, (B, T, d_model), dtype=jnp.float32)

    # nn.Linear weights stored as (in, out) = W^T; deterministic init.
    bound = 1.0 / math.sqrt(d_model)
    params = {
        "w_qkv": jax.random.uniform(k1, (d_model, 3 * d_model), jnp.float32, -bound, bound),
        "b_qkv": jax.random.uniform(k2, (1, 3 * d_model), jnp.float32, -bound, bound),
        "w_out": jax.random.uniform(k3, (d_model, d_model), jnp.float32, -bound, bound),
        "b_out": jax.random.uniform(k4, (1, d_model), jnp.float32, -bound, bound),
    }

    ref = reference(x, params, n_head)

    # f32-operand pass (tolerance accounts for approx reciprocal / MXU f32 mode).
    out_f32 = jax.block_until_ready(causal_self_attention(x, params, n_head))
    assert out_f32.shape == (B, T, d_model)
    assert jnp.allclose(out_f32, ref, atol=1e-2, rtol=1e-2), "f32 mismatch vs reference"

    # bf16-operand pass (f32 accumulation + f32 softmax stats inside kernels).
    out_bf16 = jax.block_until_ready(
        causal_self_attention(x, params, n_head, compute_dtype=jnp.bfloat16))
    assert jnp.allclose(out_bf16.astype(jnp.float32), ref, atol=1.5e-1, rtol=1.5e-1), \
        "bf16 mismatch vs reference"

    print("KERNEL_OK")
</pallas_src>

<mosaic_0001>
module attributes {stable_mosaic.version = 11 : i64} {
  func.func @_linear_kernel(%arg0: i32, %arg1: i32, %arg2: i32, %arg3: memref<32x128xf32, #tpu.memory_space<vmem>>, %arg4: memref<128x128xf32, #tpu.memory_space<vmem>>, %arg5: memref<1x128xf32, #tpu.memory_space<vmem>>, %arg6: memref<32x128xf32, #tpu.memory_space<vmem>>, %arg7: memref<32x128xf32, #tpu.memory_space<vmem>>) attributes {dimension_semantics = [#tpu.dimension_semantics<parallel>, #tpu.dimension_semantics<parallel>, #tpu.dimension_semantics<arbitrary>], iteration_bounds = array<i64: 1, 3, 1>, scalar_prefetch = 0 : i64, scratch_operands = 1 : i64, tpu.core_type = #tpu.core_type<tc>, window_params = [{transform_indices = @transform_0, window_bounds = array<i64: 32, 128>}, {transform_indices = @transform_1, window_bounds = array<i64: 128, 128>}, {transform_indices = @transform_2, window_bounds = array<i64: 1, 128>}, {transform_indices = @transform_3, window_bounds = array<i64: 32, 128>}]} {
    %c0_i32 = arith.constant 0 : i32
    %0 = arith.cmpi eq, %arg2, %c0_i32 : i32
    %1 = arith.extui %0 : i1 to i32
    %c0_i32_0 = arith.constant 0 : i32
    %2 = arith.cmpi ne, %1, %c0_i32_0 : i32
    scf.if %2 {
      %cst_10 = arith.constant 0.000000e+00 : f32
      %12 = vector.broadcast %cst_10 : f32 to vector<32x128xf32>
      %c0_11 = arith.constant 0 : index
      %c0_12 = arith.constant 0 : index
      %13 = vector.load %arg7[%c0_11, %c0_12] : memref<32x128xf32, #tpu.memory_space<vmem>>, vector<32x128xf32>
      tpu.vector_store %arg7[%c0_11, %c0_12], %12 {strides = array<i32>} : memref<32x128xf32, #tpu.memory_space<vmem>>, vector<32x128xf32>,
    } else {
    }
    %c0 = arith.constant 0 : index
    %c0_1 = arith.constant 0 : index
    %3 = vector.load %arg7[%c0, %c0_1] : memref<32x128xf32, #tpu.memory_space<vmem>>, vector<32x128xf32>
    %c0_2 = arith.constant 0 : index
    %c0_3 = arith.constant 0 : index
    %4 = vector.load %arg3[%c0_2, %c0_3] : memref<32x128xf32, #tpu.memory_space<vmem>>, vector<32x128xf32>
    %c0_4 = arith.constant 0 : index
    %c0_5 = arith.constant 0 : index
    %5 = vector.load %arg4[%c0_4, %c0_5] : memref<128x128xf32, #tpu.memory_space<vmem>>, vector<128x128xf32>
    %cst = arith.constant dense<0.000000e+00> : vector<32x128xf32>
    %6 = tpu.matmul %4, %5, %cst {dimension_numbers = #tpu.dot_dimension_numbers<[1], [0], [0], [1], [0, 0, 1, 1], [], []>} : vector<32x128xf32>, vector<128x128xf32>, vector<32x128xf32> -> vector<32x128xf32>
    %7 = arith.addf %3, %6 : vector<32x128xf32>
    %c0_6 = arith.constant 0 : index
    %c0_7 = arith.constant 0 : index
    %8 = vector.load %arg7[%c0_6, %c0_7] : memref<32x128xf32, #tpu.memory_space<vmem>>, vector<32x128xf32>
    tpu.vector_store %arg7[%c0_6, %c0_7], %7 {strides = array<i32>} : memref<32x128xf32, #tpu.memory_space<vmem>>, vector<32x128xf32>,
    %c0_i32_8 = arith.constant 0 : i32
    %9 = arith.cmpi eq, %arg2, %c0_i32_8 : i32
    %10 = arith.extui %9 : i1 to i32
    %c0_i32_9 = arith.constant 0 : i32
    %11 = arith.cmpi ne, %10, %c0_i32_9 : i32
    scf.if %11 {
      %c0_10 = arith.constant 0 : index
      %c0_11 = arith.constant 0 : index
      %12 = vector.load %arg7[%c0_10, %c0_11] : memref<32x128xf32, #tpu.memory_space<vmem>>, vector<32x128xf32>
      %c0_12 = arith.constant 0 : index
      %c0_13 = arith.constant 0 : index
      %13 = vector.load %arg5[%c0_12, %c0_13] : memref<1x128xf32, #tpu.memory_space<vmem>>, vector<1x128xf32>
      %14 = vector.broadcast %13 : vector<1x128xf32> to vector<32x128xf32>
      %15 = arith.addf %12, %14 : vector<32x128xf32>
      %c0_14 = arith.constant 0 : index
      %c0_15 = arith.constant 0 : index
      %16 = vector.load %arg6[%c0_14, %c0_15] : memref<32x128xf32, #tpu.memory_space<vmem>>, vector<32x128xf32>
      tpu.vector_store %arg6[%c0_14, %c0_15], %15 {strides = array<i32>} : memref<32x128xf32, #tpu.memory_space<vmem>>, vector<32x128xf32>,
    } else {
    }
    return
  }
  func.func @transform_0(%arg0: i32, %arg1: i32, %arg2: i32) -> (i32, i32) {
    %c0_i32 = arith.constant 0 : i32
    return %arg0, %arg2 : i32, i32
  }
  func.func @transform_1(%arg0: i32, %arg1: i32, %arg2: i32) -> (i32, i32) {
    %c0_i32 = arith.constant 0 : i32
    return %arg2, %arg1 : i32, i32
  }
  func.func @transform_2(%arg0: i32, %arg1: i32, %arg2: i32) -> (i32, i32) {
    %c0_i32 = arith.constant 0 : i32
    %c0_i32_0 = arith.constant 0 : i32
    return %c0_i32, %arg1 : i32, i32
  }
  func.func @transform_3(%arg0: i32, %arg1: i32, %arg2: i32) -> (i32, i32) {
    %c0_i32 = arith.constant 0 : i32
    return %arg0, %arg1 : i32, i32
  }
}

</mosaic_0001>

<bundles_post_ra>
// kernel: tpu_custom_call.1
= control target key start
LH: loop header
LB: loop body
LE: loop exit
PB: predicated region body
PF: predicated region fallthrough
CT: control target
= control target key end

     0   :  { %8 = vsyncpa [#allocation4], 0  ;;  %s1089_s0 = inlined_call_operand.hbm [shape: f32[32,128], index: 0, kind: input, shape index: {}]   ;;  %s1090_s1 = inlined_call_operand.hbm [shape: f32[128,384], index: 1, kind: input, shape index: {}]   ;;  %s1091_s2 = inlined_call_operand.vmem [shape: f32[1,384], index: 2, kind: input, shape index: {}]   ;;  %s1092_s3 = inlined_call_operand.hbm [shape: f32[32,384], index: 3, kind: output, shape index: {}]  }
   0x1   :  { %9 = vsyncpa [#allocation7], 0 }
   0x2   :  { %11 = vsyncpa [#allocation7 + $0x1], 0 }
   0x3   :  { %12 = vsyncpa [#allocation5], 0 }
   0x4   :  { %14 = vsyncpa [#allocation5 + $0x1], 0  ;;  %s887_s12 = smov 0   ;;  %s889_s13 = smov 0  }
   0x5   :  { %s891_s14 = smov 0   ;;  %s893_s15 = smov 0  }
   0x6   :  { %s895_s16 = smov 0   ;;  %s897_s17 = smov 0  }
   0x7 LB: > { %1098 = sst [smem:[#allocation12_spill]] %s836_s12  ;;  %s533_s18 = sadd.s32 4294967295, %s856_s17   ;;  %s856_s17 = sphi %s897_s17, %s20_s17   ;;  %s852_s16 = sphi %s895_s16, %s1119_s16   ;;  %s848_s15 = sphi %s893_s15, %s1118_s15   ;;  %s844_s14 = sphi %s891_s14, %s1117_s14   ;;  %s840_s13 = sphi %s889_s13, %s1116_s13   ;;  %s836_s12 = sphi %s887_s12, %s1115_s12  }
   0x8   : > { %s534_s19 = sadd.s32 4294967294, %s856_s17   ;;  %p83_p0 = scmp.ne.s32.totalorder %s844_s14, %s840_s13 }
   0x9   : > { %p84_p1 = scmp.eq.s32.totalorder %s856_s17, 0  ;;  %p89_p2 = scmp.ne.s32.totalorder %s840_s13, %s836_s12 }
   0xa   : > { %p924_p3 = scmp.eq.s32.totalorder %s533_s18, 0  ;;  %p141_p5 = scmp.eq.s32.totalorder %s533_s18, 2 }
   0xb   : > { %p928_p4 = por %p84_p1, %p83_p0  ;;  %p147_p7 = scmp.eq.s32.totalorder %s534_s19, 2 }
   0xc   : > { %p934_p6 = por %p924_p3, %p89_p2  ;;  %p938_p8 = por %p141_p5, %p83_p0 }
   0xd   : > { %p535_p9 = scmp.ge.s32.totalorder %s856_s17, 1  ;;  %p943_p10 = por %p147_p7, %p89_p2 }
   0xe   : > { %s1101_s22 = scalar_select %p934_p6, 1, 0 }
   0xf   : > { %s1102_s23 = scalar_select %p938_p8, 1, 0 }
  0x10   : > { %s1103_s24 = scalar_select %p943_p10, 1, 0 }
  0x11   : > { %p154_p11 = scmp.lt.s32.totalorder %s856_s17, 4  ;;  %s858_s26 = smov [#allocation3]  }
  0x12   : > { %1104 = sst [smem:[#allocation13_spill]] %s1103_s24  ;;  %s170_s27 = sshll.u32 %s858_s26, 4  ;;  %s171_s27 = int_to_ptr.vmem [resolvable:$true] %s170_s27 }
  0x13   : > { %p948_p12 = pnand %p535_p9, %p154_p11  ;;  %p660_p0 = scmp.lt.s32.totalorder %s856_s17, 3 }
  0x14   : > { %s35_s30 = sadd.s32 1, %s852_s16  ;;  %s729_s4 = scalar_lea.vmem %s171_s27, 512 }
  0x15   : > { %p647_p13 = pneg %p948_p12  ;;  %p963_p2 = pnand %p660_p0, %p928_p4 }
  0x16   : > { %p730_p7 = scmp.ne.s32.totalorder %s171_s27, %s729_s4  ;;  %p737_p10 = scmp.lt.s32.totalorder %s171_s27, %s171_s27 }
  0x17   : > { %p957_p1 = pnand %p647_p13, %p924_p3  ;;  %p738_p8 = scmp.lt.s32.totalorder %s729_s4, %s729_s4 }
  0x19   : > { %p720_p5 = pneg %p957_p1  ;;  %p739_p6 = por %p738_p8, %p737_p10 }
  0x1b   : > { %p732_p9 = pnand %p730_p7, %p720_p5 }
  0x1d   : > { %p733_p11 = pneg %p732_p9 }
  0x1f   : > { %p740_p13 = pnand %p739_p6, %p733_p11 }
  0x21   : > { %743 = shalt.err (!%p740_p13)
}
  0x22   : > { %s1097_s5 = smov 128   ;;  %s860_s6 = smov 8  }
  0x23   : > { %650 = dma.hbm_to_vmem [thread:$0]  (!%p957_p1), %s1089_s0, 512, %s171_s27, [#allocation4], %s1097_s5, %s1097_s5, %s860_s6  }
  0x24   : > { %p37_p4 = scmp.ge.s32.totalorder %s35_s30, 3  ;;  %s76_s9 = sadd.s32 1, %s844_s14 }
  0x25   : > { %s184_s10 = sand.u32 1, %s844_s14   ;;  %s539_s19 = sshll.u32 %s852_s16, 7 }
  0x26   : > { %s1121_s30 = smov (%p37_p4, %s35_s30), 0  ;;  %s538_s11 = sshll.u32 %s184_s10, 7 }
  0x27   : > { %s72_s18 = ssub.s32 %s852_s16, %s1121_s30  ;;  %s196_s28 = scalar_lea.hbm %s1090_s1, %s539_s19 }
  0x28   : > { %p74_p6 = scmp.eq.s32.totalorder %s72_s18, 0  ;;  %s188_s4 = scalar_lea.vmem [#allocation6], %s538_s11 }
  0x29   : > { %s197_s24 = sshll.u32 %s188_s4, 4  ;;  %s185_s27 = scalar_lea.sflag [#allocation7], %s184_s10  ;;  %s198_s24 = int_to_ptr.vmem [resolvable:$true] %s197_s24 }
  0x2a   : > { %s989_s12 = scalar_select %p74_p6, %s844_s14, %s76_s9  }
  0x2b   : > { %p746_p8 = pneg %p963_p2  ;;  %s757_s7 = scalar_lea.vmem %s198_s24, 2048 }
  0x2c   : > { %p758_p10 = scmp.ne.s32.totalorder %s198_s24, %s757_s7  ;;  %s861_s8 = smov [#allocation6]  }
  0x2d   : > { %s762_s5 = sshll.u32 %s861_s8, 4  ;;  %s763_s5 = int_to_ptr.vmem [resolvable:$false] %s762_s5 }
  0x2e   : > { %p760_p0 = pnand %p758_p10, %p746_p8  ;;  %s764_s18 = scalar_lea.vmem %s763_s5, 4096 }
  0x2f   : > { %p765_p5 = scmp.lt.s32.totalorder %s198_s24, %s763_s5  ;;  %p766_p7 = scmp.lt.s32.totalorder %s764_s18, %s757_s7 }
  0x30   : > { %p761_p1 = pneg %p760_p0 }
  0x31   : > { %p767_p9 = por %p766_p7, %p765_p5 }
  0x33   : > { %p768_p11 = pnand %p767_p9, %p761_p1 }
  0x35   : > { %771 = shalt.err (!%p768_p11)
}
  0x36   : > { %s862_s11 = smov 384   ;;  %s1108_s9 = smov 128  }
  0x37   : > { %654 = dma.hbm_to_vmem [thread:$0]  (!%p963_p2), %s196_s28, 2048, %s198_s24, %s185_s27, %s862_s11, %s1108_s9, %s860_s6  }
  0x38   : > { %215 = sbr.rel (%p948_p12) target bundleno = 312 (0x138), region = 32 }
  0x3d   : > { %823 = dma.done.wait (%p924_p3), [#allocation4], 512  }
  0x3e   : > { %825 = vsyncadd (%p924_p3), [#allocation4], 4294966784  ;;  %s1004_s5 = sand.u32 1, %s840_s13   ;;  %p1109_p2 = scmp.ne.s32.totalorder %s1101_s22, 0 }
  0x3f   : > { %s542_s10 = sshll.u32 %s1004_s5, 7  ;;  %s222_s29 = scalar_lea.sflag [#allocation7], %s1004_s5 }
  0x40   : > { %s1008_s19 = scalar_lea.vmem [#allocation6], %s542_s10 }
  0x41   : > { %827 = dma.done.wait (%p1109_p2), %s222_s29, 2048  }
  0x42   : > { %829 = vsyncadd (%p1109_p2), %s222_s29, 4294965248  ;;  %v288_v0 = vld [vmem:[%s1008_s19 + $0x78] sm:$0xff]  ;;  %v287_v1 = vld [vmem:[%s1008_s19 + $0x70] sm:$0xff]  ;;  %p253_p3 = scmp.lt.s32.totalorder %s848_s15, 2  ;;  %s543_s22 = sshll.u32 %s1004_s5, 5 }
  0x43   : > { %569 = vmatprep.subr.mxu0 %v288_v0  ;;  %607 = vmatprep.subr.mxu1 %v288_v0  ;;  %v286_v2 = vld [vmem:[%s1008_s19 + $0x68] sm:$0xff]  ;;  %v285_v3 = vld [vmem:[%s1008_s19 + $0x60] sm:$0xff]  ;;  %v284_v4 = vld [vmem:[%s1008_s19 + $0x58] sm:$0xff]  ;;  %s250_s21 = scalar_lea.vmem [#allocation8], %s543_s22  ;;  %s546_s28 = sshll.u32 %s848_s15, 7 }
  0x44   : > { %570 = vmatpush3.msra.mxu0 %v288_v0  ;;  %623 = vmatpush3.msra.mxu1 %v288_v0  ;;  %v283_v5 = vld [vmem:[%s1008_s19 + $0x50] sm:$0xff]  ;;  %v282_v6 = vld [vmem:[%s1008_s19 + $0x48] sm:$0xff]  ;;  %v281_v7 = vld [vmem:[%s1008_s19 + $0x40] sm:$0xff]  ;;  %s254_s20 = scalar_select %p253_p3, %s848_s15, 2 }
  0x45   : > { %571 = vmatprep.subr.mxu0 %v287_v1  ;;  %608 = vmatprep.subr.mxu1 %v287_v1  ;;  %v280_v8 = vld [vmem:[%s1008_s19 + $0x38] sm:$0xff]  ;;  %v279_v9 = vld [vmem:[%s1008_s19 + $0x30] sm:$0xff]  ;;  %v278_v10 = vld [vmem:[%s1008_s19 + $0x28] sm:$0xff]  ;;  %s420_s26 = sshll.u32 %s250_s21, 4  ;;  %s1042_s7 = scalar_lea.hbm %s1092_s3, %s546_s28  ;;  %s1037_s26 = int_to_ptr.vmem [resolvable:$true] %s420_s26 }
  0x46   : > { %572 = vmatpush3.msra.mxu0 %v287_v1  ;;  %624 = vmatpush3.msra.mxu1 %v287_v1  ;;  %v277_v11 = vld [vmem:[%s1008_s19 + $0x20] sm:$0xff]  ;;  %v276_v12 = vld [vmem:[%s1008_s19 + $0x18] sm:$0xff]  ;;  %v275_v13 = vld [vmem:[%s1008_s19 + $0x10] sm:$0xff]  ;;  %s255_s6 = scalar_lea.vmem %s1091_s2, %s254_s20  ;;  %s405_s15 = scalar_lea.sflag [#allocation5], %s1004_s5 }
  0x47   : > { %573 = vmatprep.subr.mxu0 %v286_v2  ;;  %609 = vmatprep.subr.mxu1 %v286_v2  ;;  %v274_v14 = vld [vmem:[%s1008_s19 + $0x8] sm:$0xff]  ;;  %v273_v15 = vld [vmem:[%s1008_s19] sm:$0xff]  ;;  %v271_v17 = vld [vmem:[#allocation3 + $0x10] sm:$0xff]  ;;  %s772_s8 = scalar_lea.vmem %s1037_s26, 512  ;;  %p1110_p13 = scmp.ne.s32.totalorder %s1102_s23, 0 }
  0x48   : > { %574 = vmatpush3.msra.mxu0 %v286_v2  ;;  %625 = vmatpush3.msra.mxu1 %v286_v2  ;;  %v269_v16 = vld [vmem:[#allocation3] sm:$0xff]  ;;  %v270_v18 = vld [vmem:[#allocation3 + $0x8] sm:$0xff]  ;;  %v272_v19 = vld [vmem:[#allocation3 + $0x18] sm:$0xff]  ;;  %p773_p12 = scmp.ne.s32.totalorder %s1037_s26, %s772_s8  ;;  %s863_s18 = smov [#allocation8]  }
  0x49   : > { %575 = vmatprep.subr.mxu0 %v285_v3  ;;  %610 = vmatprep.subr.mxu1 %v285_v3  ;;  %v544_v20 = vld [vmem:[%s255_s6] ss:$0 sm:$0xff]  ;;  %s776_s11 = sshll.u32 %s863_s18, 4  ;;  %s777_s11 = int_to_ptr.vmem [resolvable:$false] %s776_s11 }
  0x4a   : > { %576 = vmatpush3.msra.mxu0 %v285_v3  ;;  %626 = vmatpush3.msra.mxu1 %v285_v3  ;;  %p774_p4 = pnand %p773_p12, %p1110_p13  ;;  %s778_s9 = scalar_lea.vmem %s777_s11, 1024 }
  0x4b   : > { %577 = vmatprep.subr.mxu0 %v284_v4  ;;  %611 = vmatprep.subr.mxu1 %v284_v4  ;;  %p779_p8 = scmp.lt.s32.totalorder %s1037_s26, %s777_s11  ;;  %p780_p10 = scmp.lt.s32.totalorder %s778_s9, %s772_s8 }
  0x4c   : > { %578 = vmatpush3.msra.mxu0 %v284_v4  ;;  %627 = vmatpush3.msra.mxu1 %v284_v4  ;;  %p775_p6 = pneg %p774_p4 }
  0x4d   : > { %579 = vmatprep.subr.mxu0 %v283_v5  ;;  %612 = vmatprep.subr.mxu1 %v283_v5  ;;  %p781_p0 = por %p780_p10, %p779_p8 }
  0x4e   : > { %580 = vmatpush3.msra.mxu0 %v283_v5  ;;  %628 = vmatpush3.msra.mxu1 %v283_v5 }
  0x4f   : > { %581 = vmatprep.subr.mxu0 %v282_v6  ;;  %613 = vmatprep.subr.mxu1 %v282_v6  ;;  %p782_p1 = pnand %p781_p0, %p775_p6 }
  0x50   : > { %582 = vmatpush3.msra.mxu0 %v282_v6  ;;  %629 = vmatpush3.msra.mxu1 %v282_v6 }
  0x51   : > { %583 = vmatprep.subr.mxu0 %v281_v7  ;;  %614 = vmatprep.subr.mxu1 %v281_v7 }
  0x52   : > { %584 = vmatpush3.msra.mxu0 %v281_v7  ;;  %630 = vmatpush3.msra.mxu1 %v281_v7 }
  0x53   : > { %585 = vmatprep.subr.mxu0 %v280_v8  ;;  %615 = vmatprep.subr.mxu1 %v280_v8 }
  0x54   : > { %586 = vmatpush3.msra.mxu0 %v280_v8  ;;  %631 = vmatpush3.msra.mxu1 %v280_v8 }
  0x55   : > { %587 = vmatprep.subr.mxu0 %v279_v9  ;;  %616 = vmatprep.subr.mxu1 %v279_v9 }
  0x56   : > { %588 = vmatpush3.msra.mxu0 %v279_v9  ;;  %632 = vmatpush3.msra.mxu1 %v279_v9 }
  0x57   : > { %589 = vmatprep.subr.mxu0 %v278_v10  ;;  %617 = vmatprep.subr.mxu1 %v278_v10 }
  0x58   : > { %590 = vmatpush3.msra.mxu0 %v278_v10  ;;  %633 = vmatpush3.msra.mxu1 %v278_v10 }
  0x59   : > { %591 = vmatprep.subr.mxu0 %v277_v11  ;;  %618 = vmatprep.subr.mxu1 %v277_v11 }
  0x5a   : > { %592 = vmatpush3.msra.mxu0 %v277_v11  ;;  %634 = vmatpush3.msra.mxu1 %v277_v11 }
  0x5b   : > { %593 = vmatprep.subr.mxu0 %v276_v12  ;;  %619 = vmatprep.subr.mxu1 %v276_v12 }
  0x5c   : > { %594 = vmatpush3.msra.mxu0 %v276_v12  ;;  %635 = vmatpush3.msra.mxu1 %v276_v12 }
  0x5d   : > { %595 = vmatprep.subr.mxu0 %v275_v13  ;;  %620 = vmatprep.subr.mxu1 %v275_v13 }
  0x5e   : > { %596 = vmatpush3.msra.mxu0 %v275_v13  ;;  %636 = vmatpush3.msra.mxu1 %v275_v13 }
  0x5f   : > { %597 = vmatprep.subr.mxu0 %v274_v14  ;;  %621 = vmatprep.subr.mxu1 %v274_v14 }
  0x60   : > { %598 = vmatpush3.msra.mxu0 %v274_v14  ;;  %637 = vmatpush3.msra.mxu1 %v274_v14 }
  0x61   : > { %599 = vmatprep.subr.mxu0 %v273_v15  ;;  %622 = vmatprep.subr.mxu1 %v273_v15 }
  0x62   : > { %600 = vmatpush3.msra.mxu0 %v273_v15  ;;  %638 = vmatpush3.msra.mxu1 %v273_v15 }
  0x63   : > { %601 = vmatprep.mubr.f32.mxu0 %v269_v16  ;;  %604 = vmatprep.mubr.f32.mxu1 %v271_v17 }
  0x64   : > { %602 = vmatmul.mubr.f32.vlgmr.msra.gmra.mxu0 %v270_v18  ;;  %605 = vmatmul.mubr.f32.vlgmr.msra.gmra.mxu1 %v272_v19 }
 0x124   : > { %v603_v21 = vpop.f32.mrf.mxu0  ;;  %v606_v22 = vpop.f32.mrf.mxu1 }
 0x125   : > { %v397_v23 = vadd.f32 %v603_v21, %v544_v20  ;;  %v399_v24 = vadd.f32 %v606_v22, %v544_v20 }
 0x126   : > { %v355_v25 = vpop.f32.mrf.mxu0  ;;  %v365_v26 = vpop.f32.mrf.mxu1 }
 0x127   : > { %401 = vst [vmem:[%s250_s21 + $0x8] sm:$0xff] %v397_v23  ;;  %403 = vst [vmem:[%s250_s21 + $0x18] sm:$0xff] %v399_v24  ;;  %v396_v27 = vadd.f32 %v544_v20, %v355_v25  ;;  %v398_v28 = vadd.f32 %v544_v20, %v365_v26 }
 0x129   : > { %400 = vst [vmem:[%s250_s21] sm:$0xff] %v396_v27  ;;  %402 = vst [vmem:[%s250_s21 + $0x10] sm:$0xff] %v398_v28 }
 0x12a   : > { %785 = shalt.err (!%p782_p1)
}
 0x12b   : > { %s786_s10 = scalar_lea.hbm %s1042_s7, 512  ;;  %s790_s20 = scalar_lea.hbm %s1092_s3, 1536 }
 0x12c   : > { %p787_p5 = scmp.ne.s32.totalorder %s1042_s7, %s786_s10  ;;  %p791_p11 = scmp.lt.s32.totalorder %s1042_s7, %s1092_s3 }
 0x12d   : > { %p792_p2 = scmp.lt.s32.totalorder %s790_s20, %s786_s10 }
 0x12e   : > { %p788_p7 = pnand %p787_p5, %p1110_p13 }
 0x12f   : > { %p793_p3 = por %p792_p2, %p791_p11 }
 0x130   : > { %p789_p9 = pneg %p788_p7 }
 0x132   : > { %p794_p12 = pnand %p793_p3, %p789_p9 }
 0x134   : > { %797 = shalt.err (!%p794_p12)
}
 0x135   : > { %s864_s25 = smov 128   ;;  %s865_s6 = smov 384  }
 0x136   : > { %s866_s21 = smov 8  }
 0x137   : > { %645 = dma.vmem_to_hbm [thread:$0]  (%p1110_p13), %s1037_s26, 512, %s1042_s7, %s405_s15, %s864_s25, %s865_s6, %s866_s21  }
 0x138 PF: > { %s1111_s28 = sld [smem:[#allocation12_spill]]  ;;  %p662_p4 = scmp.ge.s32.totalorder %s856_s17, 2 }
 0x139   : > { %s1112_s4 = sld [smem:[#allocation13_spill]] }
 0x13e   : > { %s435_s27 = sand.u32 1, %s1111_s28  }
 0x13f   : > { %p1113_p6 = scmp.ne.s32.totalorder %s1112_s4, 0  ;;  %s436_s8 = scalar_lea.sflag [#allocation5], %s435_s27 }
 0x141   : > { %p656_p8 = pnand %p662_p4, %p1113_p6 }
 0x143   : > { %p657_p10 = pneg %p656_p8 }
 0x145   : > { %831 = dma.done.wait (%p657_p10), %s436_s8, 512  }
 0x146   : > { %833 = vsyncadd (%p657_p10), %s436_s8, 4294966784  ;;  %s20_s17 = sadd.s32 1, %s856_s17   ;;  %s1114_s23 = smov %s989_s12 }
 0x147   : > { %p17_p0 = scmp.ge.s32.totalorder %s20_s17, 5   ;;  %s1115_s12 = smov %s840_s13 }
 0x148   : > { %s1116_s13 = smov %s844_s14  ;;  %s1117_s14 = smov %s1114_s23 }
 0x149   : > { %s1118_s15 = smov %s852_s16  ;;  %s1119_s16 = smov %s1121_s30 }
 0x14a   :  { %19 = sbr.rel (!%p17_p0) target bundleno = 7 (0x7), region = 94 }
 0x14f   :  { %441 = vsyncpa [#allocation4], 1 }
 0x150   :  { %443 = vsyncpa [#allocation4 + $0x1], 1 }
 0x151   :  { %444 = vsyncpa [#allocation7], 1 }
 0x152   :  { %446 = vsyncpa [#allocation7 + $0x1], 1 }
 0x153   :  { %447 = vsyncpa [#allocation5], 1 }
 0x154   :  { %449 = vsyncpa [#allocation5 + $0x1], 1 }

</bundles_post_ra>
